<compile_context>
chip_gen: v6e
topology: v6e:2x2x1
jax: 0.10.0
libtpu: 0.0.40
codegen_flags: <defaults>
</compile_context>

<pallas_src>
import jax
import jax.numpy as jnp
from jax.experimental import pallas as pl
from jax.experimental.pallas import tpu as pltpu


# ----------------------------------------------------------------------------
# Pallas kernel: phi(x) = elu(x) + 1  == where(x > 0, x + 1, exp(x))
# Pure VPU (compare/select/add) + EUP (exp) elementwise work.
# ----------------------------------------------------------------------------
def _elu_plus_one_kernel(x_ref, o_ref):
    x = x_ref[...].astype(jnp.float32)
    y = jnp.where(x > 0, x + 1.0, jnp.exp(x))
    o_ref[...] = y.astype(o_ref.dtype)


def _elu_plus_one_pallas(x, *, lanes=1024, max_block_rows=512):
    """Elementwise elu(x)+1 over an arbitrarily-shaped array.

    The array is flattened to a lane-dense (rows, lanes) slab (lanes = 1024,
    a large multiple of 128) and tiled with multi-MiB blocks.  The tail is
    zero-padded in the wrapper and sliced off afterwards.
    """
    orig_shape = x.shape
    orig_dtype = x.dtype
    n = int(x.size)
    if n == 0:
        return x

    # Rows needed at `lanes` columns.
    rows_needed = -(-n // lanes)
    # Block rows: multiple of 8, at most max_block_rows, no larger than needed.
    block_rows = min(max_block_rows, ((rows_needed + 7) // 8) * 8)
    # Pad rows up to a whole number of blocks so every grid step is full.
    num_blocks = -(-rows_needed // block_rows)
    rows_padded = num_blocks * block_rows
    n_padded = rows_padded * lanes

    flat = x.reshape(-1)
    if n_padded != n:
        flat = jnp.pad(flat, (0, n_padded - n))
    x2d = flat.reshape(rows_padded, lanes)

    itemsize = jnp.dtype(orig_dtype).itemsize
    cost = pl.CostEstimate(
        flops=2 * n_padded,              # compare + add (roughly)
        transcendentals=n_padded,        # exp on the non-positive branch
        bytes_accessed=2 * n_padded * itemsize,
    )

    grid = (pl.cdiv(rows_padded, block_rows),)
    y2d = pl.pallas_call(
        _elu_plus_one_kernel,
        out_shape=jax.ShapeDtypeStruct((rows_padded, lanes), orig_dtype),
        grid_spec=pl.GridSpec(
            grid=grid,
            in_specs=[pl.BlockSpec((block_rows, lanes), lambda i: (i, 0))],
            out_specs=pl.BlockSpec((block_rows, lanes), lambda i: (i, 0)),
        ),
        compiler_params=pltpu.CompilerParams(
            dimension_semantics=("parallel",),
            # 4 x 2 MiB (double-buffered in + out at max tile) << 32 MiB;
            # explicit so we never inherit a generation-mismatched default.
            vmem_limit_bytes=32 * 1024 * 1024,
        ),
        cost_estimate=cost,
    )(x2d)

    y = y2d.reshape(-1)
    if n_padded != n:
        y = y[:n]
    return y.reshape(orig_shape)


# ----------------------------------------------------------------------------
# JAX mirror of the PyTorch FeatureMap interface
# ----------------------------------------------------------------------------
class FeatureMap:
    """Define the FeatureMap interface (JAX/Pallas port)."""

    def __init__(self, query_dims):
        self.query_dims = query_dims

    def new_feature_map(self, dtype=jnp.float32):
        """Re-sample parameters (no-op for deterministic feature maps)."""
        pass

    def forward_queries(self, x):
        """Encode the queries `x` using this feature map."""
        return self(x)

    def forward_keys(self, x):
        """Encode the keys `x` using this feature map."""
        return self(x)

    def __call__(self, x):
        return self.forward(x)

    def forward(self, x):
        raise NotImplementedError()

    @classmethod
    def factory(cls, *args, **kwargs):
        """Return a function that, called with query_dims, builds an instance."""
        def inner(query_dims):
            return cls(query_dims, *args, **kwargs)
        return inner


class EluFeatureMap(FeatureMap):
    """Canonical concrete feature map: phi(x) = elu(x) + 1, via Pallas."""

    def forward(self, x):
        # x: (B, L, H, D) with D == self.query_dims
        assert x.shape[-1] == self.query_dims
        return _elu_plus_one_pallas(x)


# ----------------------------------------------------------------------------
# Demo / self-test
# ----------------------------------------------------------------------------
if __name__ == "__main__":
    key = jax.random.PRNGKey(0)
    B, L, H, D = 2, 8, 4, 32  # batch, seq, heads, query_dims
    x = jax.random.normal(key, (B, L, H, D), dtype=jnp.float32)

    fmap_factory = EluFeatureMap.factory()
    fmap = fmap_factory(D)
    fmap.new_feature_map(jnp.float32)

    q_feat = fmap.forward_queries(x)
    k_feat = fmap.forward_keys(x)
    jax.block_until_ready(q_feat)
    jax.block_until_ready(k_feat)

    # Reference check in plain JAX.
    ref = jnp.where(x > 0, x + 1.0, jnp.exp(x))
    assert q_feat.shape == x.shape and q_feat.dtype == x.dtype
    assert jnp.allclose(q_feat, ref, atol=1e-5, rtol=1e-5)
    assert jnp.allclose(k_feat, ref, atol=1e-5, rtol=1e-5)

    # Also exercise a ragged shape (tail padding path) and a bf16 input.
    x_odd = jax.random.normal(jax.random.PRNGKey(1), (3, 7, 5, 33), jnp.float32)
    y_odd = _elu_plus_one_pallas(x_odd)
    ref_odd = jnp.where(x_odd > 0, x_odd + 1.0, jnp.exp(x_odd))
    assert jnp.allclose(y_odd, ref_odd, atol=1e-5, rtol=1e-5)

    x_bf16 = x.astype(jnp.bfloat16)
    y_bf16 = _elu_plus_one_pallas(x_bf16)
    jax.block_until_ready(y_bf16)
    assert y_bf16.dtype == jnp.bfloat16

    print("KERNEL_OK")
</pallas_src>

<mosaic_0001>
module attributes {stable_mosaic.version = 11 : i64} {
  func.func @_elu_plus_one_kernel(%arg0: i32, %arg1: memref<8x1024xf32, #tpu.memory_space<vmem>>, %arg2: memref<8x1024xf32, #tpu.memory_space<vmem>>) attributes {dimension_semantics = [#tpu.dimension_semantics<parallel>], iteration_bounds = array<i64: 1>, scalar_prefetch = 0 : i64, scratch_operands = 0 : i64, tpu.core_type = #tpu.core_type<tc>, window_params = [{transform_indices = @transform_0, window_bounds = array<i64: 8, 1024>}, {transform_indices = @transform_1, window_bounds = array<i64: 8, 1024>}]} {
    %c0 = arith.constant 0 : index
    %c0_0 = arith.constant 0 : index
    %0 = vector.load %arg1[%c0, %c0_0] : memref<8x1024xf32, #tpu.memory_space<vmem>>, vector<8x1024xf32>
    %cst = arith.constant 0.000000e+00 : f32
    %1 = vector.broadcast %cst : f32 to vector<8x1024xf32>
    %2 = arith.cmpf ogt, %0, %1 : vector<8x1024xf32>
    %cst_1 = arith.constant 1.000000e+00 : f32
    %3 = vector.broadcast %cst_1 : f32 to vector<8x1024xf32>
    %4 = arith.addf %0, %3 : vector<8x1024xf32>
    %5 = math.exp %0 : vector<8x1024xf32>
    %6 = arith.select %2, %4, %5 : vector<8x1024xi1>, vector<8x1024xf32>
    %c0_2 = arith.constant 0 : index
    %c0_3 = arith.constant 0 : index
    %7 = vector.load %arg2[%c0_2, %c0_3] : memref<8x1024xf32, #tpu.memory_space<vmem>>, vector<8x1024xf32>
    tpu.vector_store %arg2[%c0_2, %c0_3], %6 {strides = array<i32>} : memref<8x1024xf32, #tpu.memory_space<vmem>>, vector<8x1024xf32>,
    return
  }
  func.func @transform_0(%arg0: i32) -> (i32, i32) {
    %c0_i32 = arith.constant 0 : i32
    %c0_i32_0 = arith.constant 0 : i32
    return %arg0, %c0_i32 : i32, i32
  }
  func.func @transform_1(%arg0: i32) -> (i32, i32) {
    %c0_i32 = arith.constant 0 : i32
    %c0_i32_0 = arith.constant 0 : i32
    return %arg0, %c0_i32 : i32, i32
  }
}

</mosaic_0001>

<bundles_post_ra>
// kernel: tpu_custom_call.1
= control target key start
LH: loop header
LB: loop body
LE: loop exit
PB: predicated region body
PF: predicated region fallthrough
CT: control target
= control target key end

     0   :  { %6 = vsyncpa [#allocation3], 0  ;;  %s173_s0 = inlined_call_operand.hbm [shape: f32[8,1024], index: 0, kind: input, shape index: {}]   ;;  %s174_s1 = inlined_call_operand.hbm [shape: f32[8,1024], index: 1, kind: output, shape index: {}]  }
   0x1   :  { %7 = vsyncpa [#allocation4], 0  ;;  %s154_s6 = smov [#allocation2]  }
   0x2   :  { %s14_s7 = sshll.u32 %s154_s6, 4  ;;  %s15_s7 = int_to_ptr.vmem [resolvable:$true] %s14_s7 }
   0x3   :  { %s118_s8 = scalar_lea.vmem %s15_s7, 1024  ;;  %p123_p1 = scmp.lt.s32.totalorder %s15_s7, %s15_s7 }
   0x4   :  { %p119_p0 = scmp.ne.s32.totalorder %s15_s7, %s118_s8  ;;  %p124_p2 = scmp.lt.s32.totalorder %s118_s8, %s118_s8 }
   0x6   :  { %p125_p3 = por %p124_p2, %p123_p1 }
   0x8   :  { %p126_p4 = pnand %p125_p3, %p119_p0 }
   0xa   :  { %129 = shalt.err (!%p126_p4)
}
   0xb   :  { %17 = dma.hbm_to_vmem [thread:$0]  %s173_s0, 1024, %s15_s7, [#allocation3]  }
   0xc   :  { %150 = dma.done.wait [#allocation3], 1024  }
   0xd   :  { %151 = vsyncadd [#allocation3], 4294966272  ;;  %v21_v0 = vld [vmem:[#allocation2] sm:$0xff]  ;;  %v22_v1 = vld [vmem:[#allocation2 + $0x8] sm:$0xff]  ;;  %s155_s0 = smov [#allocation5]  }
   0xe   :  { %v23_v2 = vld [vmem:[#allocation2 + $0x10] sm:$0xff]  ;;  %v45_v3 = vmul.f32 1.442695, %v21_v0  ;;  %v24_v4 = vld [vmem:[#allocation2 + $0x18] sm:$0xff]  ;;  %v47_v5 = vmul.f32 1.442695, %v22_v1 }
   0xf   :  { %v25_v6 = vld [vmem:[#allocation2 + $0x20] sm:$0xff]  ;;  %v49_v7 = vmul.f32 1.442695, %v23_v2  ;;  %v26_v8 = vld [vmem:[#allocation2 + $0x28] sm:$0xff]  ;;  %v51_v9 = vmul.f32 1.442695, %v24_v4 }
  0x10   :  { %94 = vpow2.f32 %v45_v3  ;;  %v27_v10 = vld [vmem:[#allocation2 + $0x30] sm:$0xff]  ;;  %v53_v11 = vmul.f32 1.442695, %v25_v6  ;;  %v28_v12 = vld [vmem:[#allocation2 + $0x38] sm:$0xff]  ;;  %v55_v13 = vmul.f32 1.442695, %v26_v8 }
  0x11   :  { %96 = vpow2.f32 %v47_v5  ;;  %v57_v14 = vmul.f32 1.442695, %v27_v10  ;;  %v59_v15 = vmul.f32 1.442695, %v28_v12  ;;  %v37_v16 = vadd.f32 1.0, %v21_v0  ;;  %s83_s11 = sshll.u32 %s155_s0, 4  ;;  %s84_s11 = int_to_ptr.vmem [resolvable:$true] %s83_s11 }
  0x12   :  { %98 = vpow2.f32 %v49_v7  ;;  %vm29_vm0 = vcmp.gt.f32.partialorder %v21_v0, 0.0  ;;  %v38_v17 = vadd.f32 1.0, %v22_v1  ;;  %vm30_vm1 = vcmp.gt.f32.partialorder %v22_v1, 0.0  ;;  %s130_s12 = scalar_lea.vmem %s84_s11, 1024  ;;  %p135_p6 = scmp.lt.s32.totalorder %s84_s11, %s84_s11 }
  0x13   :  { %100 = vpow2.f32 %v51_v9  ;;  %v39_v18 = vadd.f32 1.0, %v23_v2  ;;  %vm31_vm2 = vcmp.gt.f32.partialorder %v23_v2, 0.0  ;;  %v40_v20 = vadd.f32 1.0, %v24_v4  ;;  %p131_p5 = scmp.ne.s32.totalorder %s84_s11, %s130_s12  ;;  %p136_p7 = scmp.lt.s32.totalorder %s130_s12, %s130_s12 }
  0x14   :  { %102 = vpow2.f32 %v53_v11  ;;  %vm32_vm3 = vcmp.gt.f32.partialorder %v24_v4, 0.0  ;;  %v41_v23 = vadd.f32 1.0, %v25_v6  ;;  %vm33_vm4 = vcmp.gt.f32.partialorder %v25_v6, 0.0 }
  0x15   :  { %104 = vpow2.f32 %v55_v13  ;;  %v42_v26 = vadd.f32 1.0, %v26_v8  ;;  %vm34_vm5 = vcmp.gt.f32.partialorder %v26_v8, 0.0  ;;  %v43_v29 = vadd.f32 1.0, %v27_v10  ;;  %p137_p8 = por %p136_p7, %p135_p6 }
  0x16   :  { %106 = vpow2.f32 %v57_v14  ;;  %vm35_vm6 = vcmp.gt.f32.partialorder %v27_v10, 0.0  ;;  %v44_v32 = vadd.f32 1.0, %v28_v12  ;;  %vm36_vm7 = vcmp.gt.f32.partialorder %v28_v12, 0.0 }
  0x17   :  { %108 = vpow2.f32 %v59_v15  ;;  %p138_p9 = pnand %p137_p8, %p131_p5 }
  0x1d   :  { %v95_v19 = vpop.eup %94 }
  0x1e   :  { %v97_v21 = vpop.eup %96  ;;  %v61_v22 = vsel %vm29_vm0, %v37_v16, %v95_v19 }
  0x1f   :  { %v99_v24 = vpop.eup %98  ;;  %69 = vst [vmem:[#allocation5] sm:$0xff] %v61_v22  ;;  %v62_v25 = vsel %vm30_vm1, %v38_v17, %v97_v21 }
  0x20   :  { %v101_v27 = vpop.eup %100  ;;  %70 = vst [vmem:[#allocation5 + $0x8] sm:$0xff] %v62_v25  ;;  %v63_v28 = vsel %vm31_vm2, %v39_v18, %v99_v24 }
  0x21   :  { %v103_v30 = vpop.eup %102  ;;  %71 = vst [vmem:[#allocation5 + $0x10] sm:$0xff] %v63_v28  ;;  %v64_v31 = vsel %vm32_vm3, %v40_v20, %v101_v27 }
  0x22   :  { %v105_v33 = vpop.eup %104  ;;  %72 = vst [vmem:[#allocation5 + $0x18] sm:$0xff] %v64_v31  ;;  %v65_v34 = vsel %vm33_vm4, %v41_v23, %v103_v30 }
  0x23   :  { %v107_v35 = vpop.eup %106  ;;  %73 = vst [vmem:[#allocation5 + $0x20] sm:$0xff] %v65_v34  ;;  %v66_v36 = vsel %vm34_vm5, %v42_v26, %v105_v33 }
  0x24   :  { %v109_v37 = vpop.eup %108  ;;  %74 = vst [vmem:[#allocation5 + $0x28] sm:$0xff] %v66_v36  ;;  %v67_v38 = vsel %vm35_vm6, %v43_v29, %v107_v35 }
  0x25   :  { %75 = vst [vmem:[#allocation5 + $0x30] sm:$0xff] %v67_v38  ;;  %v68_v39 = vsel %vm36_vm7, %v44_v32, %v109_v37 }
  0x26   :  { %76 = vst [vmem:[#allocation5 + $0x38] sm:$0xff] %v68_v39 }
  0x27   :  { %141 = shalt.err (!%p138_p9)
}
  0x28   :  { %86 = dma.vmem_to_hbm [thread:$0]  %s84_s11, 1024, %s174_s1, [#allocation4]  }
  0x29   :  { %152 = dma.done.wait [#allocation4], 1024  }
  0x2a   :  { %153 = vsyncadd [#allocation4], 4294966272 }
  0x2b   :  { %90 = vsyncpa [#allocation3], 1 }
  0x2c   :  { %91 = vsyncpa [#allocation4], 1 }

</bundles_post_ra>
